<compile_context>
chip_gen: v5e
topology: v5e:2x2
jax: 0.10.0
libtpu: 0.0.40
codegen_flags: <defaults>
</compile_context>

<pallas_src>
import functools

import jax
import jax.numpy as jnp
from jax.experimental import pallas as pl
from jax.experimental.pallas import tpu as pltpu

_LANE = 128      # TPU lane width — matmul output dims padded to this
_SUBLANE = 8     # sublane granularity for row tiles / small lane pads


def _round_up(x, m):
    return (x + m - 1) // m * m


def _tpu_limits():
    """(scoped vmem_limit_bytes, multi_tensorcore?) for the local chip generation."""
    vmem_phys = 128 * 1024 * 1024
    multi_tc = False
    try:
        info = pltpu.get_tpu_info()
        vmem_phys = int(getattr(info, "vmem_capacity_bytes", vmem_phys))
    except Exception:
        pass
    try:
        kind = jax.devices()[0].device_kind.lower()
    except Exception:
        kind = ""
    if "7" in kind:                       # v7x: 2 TensorCores, 64 MiB VMEM per core
        multi_tc = True
        vmem_phys = min(vmem_phys, 64 * 1024 * 1024)
    limit = min(64 * 1024 * 1024, max(8 * 1024 * 1024, (vmem_phys * 3) // 4))
    return limit, multi_tc


_VMEM_LIMIT, _MULTI_TC = _tpu_limits()


def _tile_rows(m, per_row_bytes, weight_bytes, *, target=4096):
    """Largest row tile that fits the VMEM budget (fewer grid steps, bigger DMAs).
    Only split medium problems in two on multi-TC chips (v7x) so both cores get work;
    on single-TC v5e/v6e the split would just double per-step overhead."""
    mp = _round_up(max(m, _SUBLANE), _SUBLANE)
    budget = max(_VMEM_LIMIT // 2 - weight_bytes, 256 * 1024)
    cap = max(_SUBLANE, (budget // max(per_row_bytes, 1)) // _SUBLANE * _SUBLANE)
    tgt = min(target, cap)
    min_steps = 2 if (_MULTI_TC and mp >= 2 * _SUBLANE) else 1
    steps = max(min_steps, pl.cdiv(mp, tgt))
    return _round_up(pl.cdiv(mp, steps), _SUBLANE)


def _pad2(x, rows, cols, dtype):
    x = x.astype(dtype)
    r, c = x.shape
    if r == rows and c == cols:
        return x
    return jnp.pad(x, ((0, rows - r), (0, cols - c)))


# ----------------------------------------------------------------------------------
# Pallas kernels (bf16 MXU matmuls, f32 accumulation; bias/ReLU/mask on the VPU)
# ----------------------------------------------------------------------------------

def _edge_mlp_embed_kernel(*refs, n_pieces):
    x_refs = refs[:n_pieces]
    w1_refs = refs[n_pieces:2 * n_pieces]
    b1_ref, w2_ref, b2_ref, a_ref, m_ref, o_ref = refs[2 * n_pieces:]

    # h1 = ReLU(sum_i x_i @ W1_i + b1): W1 split row-wise so the wide edge-input concat
    # never has to be materialized / lane-padded in HBM.
    h1 = b1_ref[...]
    for x_ref, w_ref in zip(x_refs, w1_refs):
        h1 = h1 + jnp.dot(x_ref[...].astype(jnp.bfloat16), w_ref[...],
                          preferred_element_type=jnp.float32)
    h1 = jnp.maximum(h1, 0.0)
    h2 = jnp.dot(h1.astype(jnp.bfloat16), w2_ref[...],
                 preferred_element_type=jnp.float32) + b2_ref[...]
    h2 = jnp.maximum(h2, 0.0)
    # (edge_mlp(x) * mask) @ A_s == (edge_mlp(x) @ A_s) * mask for a per-row mask;
    # applying the mask after the matmul keeps the VPU multiply off the MXU feed path.
    out = jnp.dot(h2.astype(jnp.bfloat16), a_ref[...],
                  preferred_element_type=jnp.float32) * m_ref[...]
    o_ref[...] = out.astype(o_ref.dtype)


def _node_mlp_kernel(*refs, n_pieces, n_out, residual):
    x_refs = refs[:n_pieces]
    w1_refs = refs[n_pieces:2 * n_pieces]
    b1_ref, w2_ref, b2_ref, o_ref = refs[2 * n_pieces:]

    h1 = b1_ref[...]
    for x_ref, w_ref in zip(x_refs, w1_refs):
        h1 = h1 + jnp.dot(x_ref[...].astype(jnp.bfloat16), w_ref[...],
                          preferred_element_type=jnp.float32)
    h1 = jnp.maximum(h1, 0.0)
    h2 = jnp.dot(h1.astype(jnp.bfloat16), w2_ref[...],
                 preferred_element_type=jnp.float32) + b2_ref[...]

    if not residual:
        o_ref[...] = h2
    else:
        # residual = h: it's exactly the first input piece (already in VMEM, f32),
        # so no separate residual DMA is needed.
        res = x_refs[0][:, :n_out]
        if n_out == h2.shape[-1]:
            o_ref[...] = h2 + res
        else:
            o_ref[:, :n_out] = h2[:, :n_out] + res
            o_ref[:, n_out:] = h2[:, n_out:]


# ----------------------------------------------------------------------------------
# Wrappers: pieces stay at natural (f32) width, weights split row-wise & lane-padded
# ----------------------------------------------------------------------------------

def edge_mlp_embed(pieces, w1, b1, w2, b2, a_proj, mask, *, tm=None):
    """(ReLU(ReLU(concat(pieces) @ W1 + b1) @ W2 + b2) @ A_s) * mask, fused on-chip."""
    M = int(pieces[0].shape[0])
    raw_w = [int(p.shape[1]) for p in pieces]
    pad_w = [_round_up(w, _SUBLANE) for w in raw_w]
    D = sum(pad_w)
    H1, H2, Ho = int(w1.shape[1]), int(w2.shape[1]), int(a_proj.shape[1])
    H1p, H2p, Hop = (_round_up(v, _LANE) for v in (H1, H2, Ho))

    per_row = 8 * (D + 1) + 4 * (H1p + H2p) + 4 * Hop            # dbl-buffered ins/out + f32 h1/h2
    w_bytes = 2 * (D * H1p + H1p * H2p + H2p * Hop) + 4 * (H1p + H2p)
    tm = tm or _tile_rows(M, per_row, w_bytes)
    Mp = _round_up(max(M, _SUBLANE), tm)

    xs, w1s, off = [], [], 0
    for p, w, wp in zip(pieces, raw_w, pad_w):
        xs.append(_pad2(p, Mp, wp, jnp.float32))
        w1s.append(_pad2(w1[off:off + w], wp, H1p, jnp.bfloat16))
        off += w
    assert off == w1.shape[0]
    b1p = _pad2(b1, 1, H1p, jnp.float32)
    w2p = _pad2(w2, H1p, H2p, jnp.bfloat16)
    b2p = _pad2(b2, 1, H2p, jnp.float32)
    ap = _pad2(a_proj, H2p, Hop, jnp.bfloat16)
    mpad = _pad2(mask, Mp, 1, jnp.float32)

    in_specs = (
        [pl.BlockSpec((tm, wp), lambda i: (i, 0)) for wp in pad_w]
        + [pl.BlockSpec((wp, H1p), lambda i: (0, 0)) for wp in pad_w]   # resident weights
        + [pl.BlockSpec((1, H1p), lambda i: (0, 0)),
           pl.BlockSpec((H1p, H2p), lambda i: (0, 0)),
           pl.BlockSpec((1, H2p), lambda i: (0, 0)),
           pl.BlockSpec((H2p, Hop), lambda i: (0, 0)),
           pl.BlockSpec((tm, 1), lambda i: (i, 0))])

    flops = 2 * Mp * (D * H1p + H1p * H2p + H2p * Hop)
    bytes_acc = (sum(x.size for x in xs) * 4 + Mp * 4
                 + (sum(w.size for w in w1s) + w2p.size + ap.size) * 2
                 + (b1p.size + b2p.size) * 4 + Mp * Hop * 2)

    out = pl.pallas_call(
        functools.partial(_edge_mlp_embed_kernel, n_pieces=len(pieces)),
        out_shape=jax.ShapeDtypeStruct((Mp, Hop), jnp.bfloat16),   # bf16 writeback
        grid=(Mp // tm,),
        in_specs=in_specs,
        out_specs=pl.BlockSpec((tm, Hop), lambda i: (i, 0)),
        compiler_params=pltpu.CompilerParams(
            dimension_semantics=("parallel",),
            vmem_limit_bytes=_VMEM_LIMIT),
        cost_estimate=pl.CostEstimate(
            flops=flops, transcendentals=0, bytes_accessed=bytes_acc),
    )(*xs, *w1s, b1p, w2p, b2p, ap, mpad)
    return out[:M, :Ho]


def node_mlp(pieces, w1, b1, w2, b2, *, residual=True, tm=None):
    """res + ReLU(concat(pieces) @ W1 + b1) @ W2 + b2, residual = pieces[0] (= h)."""
    M = int(pieces[0].shape[0])
    raw_w = [int(p.shape[1]) for p in pieces]
    pad_w = [_round_up(w, _SUBLANE) for w in raw_w]
    D = sum(pad_w)
    H1, Ho = int(w1.shape[1]), int(w2.shape[1])
    H1p, Hop = _round_up(H1, _LANE), _round_up(Ho, _LANE)
    if residual:
        assert raw_w[0] == Ho, "residual=True requires input_nf == output_nf"

    per_row = 8 * D + 4 * H1p + 8 * Hop
    w_bytes = 2 * (D * H1p + H1p * Hop) + 4 * (H1p + Hop)
    tm = tm or _tile_rows(M, per_row, w_bytes)
    Mp = _round_up(max(M, _SUBLANE), tm)

    xs, w1s, off = [], [], 0
    for p, w, wp in zip(pieces, raw_w, pad_w):
        xs.append(_pad2(p, Mp, wp, jnp.float32))
        w1s.append(_pad2(w1[off:off + w], wp, H1p, jnp.bfloat16))
        off += w
    assert off == w1.shape[0]
    b1p = _pad2(b1, 1, H1p, jnp.float32)
    w2p = _pad2(w2, H1p, Hop, jnp.bfloat16)
    b2p = _pad2(b2, 1, Hop, jnp.float32)

    in_specs = (
        [pl.BlockSpec((tm, wp), lambda i: (i, 0)) for wp in pad_w]
        + [pl.BlockSpec((wp, H1p), lambda i: (0, 0)) for wp in pad_w]
        + [pl.BlockSpec((1, H1p), lambda i: (0, 0)),
           pl.BlockSpec((H1p, Hop), lambda i: (0, 0)),
           pl.BlockSpec((1, Hop), lambda i: (0, 0))])

    flops = 2 * Mp * (D * H1p + H1p * Hop)
    bytes_acc = (sum(x.size for x in xs) * 4
                 + (sum(w.size for w in w1s) + w2p.size) * 2
                 + (b1p.size + b2p.size) * 4 + Mp * Hop * 4)

    out = pl.pallas_call(
        functools.partial(_node_mlp_kernel, n_pieces=len(pieces),
                          n_out=Ho, residual=residual),
        out_shape=jax.ShapeDtypeStruct((Mp, Hop), jnp.float32),
        grid=(Mp // tm,),
        in_specs=in_specs,
        out_specs=pl.BlockSpec((tm, Hop), lambda i: (i, 0)),
        compiler_params=pltpu.CompilerParams(
            dimension_semantics=("parallel",),
            vmem_limit_bytes=_VMEM_LIMIT),
        cost_estimate=pl.CostEstimate(
            flops=flops, transcendentals=0, bytes_accessed=bytes_acc),
    )(*xs, *w1s, b1p, w2p, b2p)
    return out[:M, :Ho]


# ----------------------------------------------------------------------------------
# Parameters (deterministic, synthetic — shapes follow E_GCL_mask.__init__)
# ----------------------------------------------------------------------------------

def init_params(key, input_nf, output_nf, hidden_nf, deg, edges_in_d=0, nodes_attr_dim=0):
    ks = jax.random.split(key, 12)
    d_edge_in = input_nf * 2 + (9 + hidden_nf) + edges_in_d           # edge_mlp in-features
    d_node_in = input_nf + hidden_nf + nodes_attr_dim                 # node_mlp in-features
    s = 0.1
    return dict(
        # edge_mlp: Linear(d_edge_in, H) -> ReLU -> Linear(H, H) -> ReLU
        We1=jax.random.normal(ks[0], (d_edge_in, hidden_nf), jnp.float32) * s,
        be1=jax.random.normal(ks[1], (1, hidden_nf), jnp.float32) * s,
        We2=jax.random.normal(ks[2], (hidden_nf, hidden_nf), jnp.float32) * s,
        be2=jax.random.normal(ks[3], (1, hidden_nf), jnp.float32) * s,
        # node_mlp: Linear(d_node_in, H) -> ReLU -> Linear(H, output_nf)
        Wn1=jax.random.normal(ks[4], (d_node_in, hidden_nf), jnp.float32) * s,
        bn1=jax.random.normal(ks[5], (1, hidden_nf), jnp.float32) * s,
        Wn2=jax.random.normal(ks[6], (hidden_nf, output_nf), jnp.float32) * s,
        bn2=jax.random.normal(ks[7], (1, output_nf), jnp.float32) * s,
        # coord2gram embed_vec_sort(d=3, n=deg, d_out=H, varying_set_size=True)
        A_g=jax.random.normal(ks[8], (3, hidden_nf), jnp.float32),
        w_g=jax.random.normal(ks[9], (1, deg, hidden_nf), jnp.float32),
        # unsorted_segment_embed's embed_vec_sort(d=H, n=deg, d_out=H)
        A_s=jax.random.normal(ks[10], (hidden_nf, hidden_nf), jnp.float32),
        w_s=jax.random.normal(ks[11], (1, deg, hidden_nf), jnp.float32),
    )


# ----------------------------------------------------------------------------------
# E_GCL_mask forward (gathers / sorts are JAX glue, MLPs + embed matmul are Pallas)
# ----------------------------------------------------------------------------------

def e_gcl_mask_forward(params, h, edge_index, coord, edge_mask=None, edge_attr=None,
                       node_attr=None, hidden_nf=32, delta=1.0, exp=False,
                       normalize=False, residual=True):
    row, col = edge_index
    N, F = h.shape
    E = row.shape[0]
    H = hidden_nf

    # ---------------- coord2gram ----------------
    # count_num_vecs_cloud: assumes uniform, row-sorted degree (same as the torch code)
    assert E % N == 0, "E_GCL_mask requires a uniform node degree (E divisible by N)"
    deg = E // N
    cat_prep = col.reshape(N, deg)[row]                        # (E, deg)
    final_index_list = jnp.concatenate([row[:, None], col[:, None], cat_prep], axis=1)

    # prep_vec_for_embed
    populate = coord[final_index_list]                         # (E, 2+deg, 3)
    perp_vec = jnp.cross(coord[row], coord[col])[:, None, :]   # (E, 1, 3)
    vec_for_embed = jnp.concatenate([perp_vec, populate], axis=1)  # (E, 3+deg, 3)

    # calc_ug
    cat3 = vec_for_embed[:, :3, :]                             # (E, 3, 3)
    diff = cat3[:, :, None, :] - vec_for_embed[:, None, :, :]  # (E, 3, 3+deg, 3)
    cdist = jnp.sqrt(jnp.sum(diff * diff, axis=-1))            # (E, 3, 3+deg)
    norms = jnp.sqrt(jnp.sum(cat3 * cat3, axis=2))             # (E, 3)
    diag = norms[:, :, None] * jnp.eye(3, dtype=jnp.float32)[None]
    ug = cdist.at[:, :, :3].add(diag)

    gram = ug[:, :, :3]                                        # (E, 3, 3)
    projections = ug[:, :, 3:]                                 # (E, 3, deg)
    if exp:
        projections = jnp.exp(-projections / delta)
    if normalize:  # F.normalize(dim=1)
        nrm = jnp.sqrt(jnp.sum(projections ** 2, axis=1, keepdims=True))
        projections = projections / jnp.maximum(nrm, 1e-12)

    # embed_vec_sort(d=3, n=deg, d_out=H, varying_set_size=True, learnable_weights=True)
    q = (jnp.sum(jnp.abs(projections), axis=1) != 0).astype(jnp.float32)     # (E, deg)
    n = deg
    prod = jnp.einsum('edn,dh->ehn', projections, params['A_g'])             # (E, H, deg)
    prod = jnp.where(q[:, None, :] == 0, jnp.inf, prod)
    k = jnp.sum(q, axis=1)                                                   # (E,)
    i_idx = jnp.arange(1, n + 1, dtype=jnp.float32)[None, :, None]
    j_idx = jnp.arange(1, n + 1, dtype=jnp.float32)[None, None, :]
    kk = k[:, None, None]
    # torch divides by (k-1) directly and yields inf/nan when k == 1; guard that
    # degenerate single-projection case instead of propagating nan.
    denom = jnp.where(kk > 1.0, kk - 1.0, 1.0)
    interp = jnp.maximum(1.0 - jnp.abs((i_idx - 1.0) * (n - 1.0) / denom - (j_idx - 1.0)), 0.0)
    w_g = jnp.einsum('eij,jh->eih', interp, params['w_g'][0])                # (E, deg, H)
    # TODO(synk): torch.sort has no Mosaic lowering on TPU — sorting stays plain-JAX glue.
    prod_sort = jnp.sort(prod, axis=2)
    prod_sort = jnp.where(jnp.isposinf(prod_sort), 0.0, prod_sort)
    embedding = jnp.sum(prod_sort * jnp.transpose(w_g, (0, 2, 1)), axis=2)   # (E, H)
    gram_dist = gram.reshape(E, 9)

    # ---------------- edge_model + segment-embed projection (fused Pallas kernel) ----
    # Pieces are passed separately (W1 split row-wise in-kernel) so the wide edge-input
    # concat is never materialized / lane-padded in HBM.
    pieces = [h[row], h[col], gram_dist, embedding]
    if edge_attr is not None:
        pieces.append(edge_attr)
    if edge_mask is None:
        edge_mask = jnp.ones((E, 1), jnp.float32)
    # y = (edge_mlp(edge_in) * edge_mask) @ A_s — the A_s projection of
    # unsorted_segment_embed is fused into the edge-MLP kernel (bf16 writeback).
    y = edge_mlp_embed(pieces, params['We1'], params['be1'],
                       params['We2'], params['be2'], params['A_s'],
                       edge_mask.astype(jnp.float32))          # (E, H) bf16

    # ---------------- node_model ----------------
    # unsorted_segment_embed: sort + weighted reduce is JAX glue (no Mosaic sort)
    prod2 = jnp.transpose(y.reshape(N, deg, H), (0, 2, 1))     # (N, H, deg)
    prod2_sort = jnp.sort(prod2, axis=2)
    agg_embed = jnp.sum(prod2_sort.astype(jnp.float32)
                        * jnp.transpose(params['w_s'], (0, 2, 1)), axis=2)   # (N, H)

    node_pieces = [h, agg_embed]
    if node_attr is not None:
        node_pieces.append(node_attr)
    h_out = node_mlp(node_pieces, params['Wn1'], params['bn1'],
                     params['Wn2'], params['bn2'], residual=residual)
    return h_out, coord, edge_attr


# ----------------------------------------------------------------------------------

if __name__ == "__main__":
    N = 8                 # nodes
    DEG = N - 1           # fully-connected w/o self loops (uniform degree, row-sorted)
    E = N * DEG           # 56 edges
    F = 32                # input_nf = output_nf (residual requires equal)
    H = 32                # hidden_nf

    key = jax.random.PRNGKey(0)
    k_h, k_c, k_m, k_p = jax.random.split(key, 4)

    h = jax.random.normal(k_h, (N, F), jnp.float32)
    coord = jax.random.normal(k_c, (N, 3), jnp.float32)

    row = jnp.repeat(jnp.arange(N, dtype=jnp.int32), DEG)
    col = jnp.asarray([j for i in range(N) for j in range(N) if j != i], dtype=jnp.int32)
    edge_index = (row, col)

    edge_mask = (jax.random.uniform(k_m, (E, 1)) > 0.1).astype(jnp.float32)

    params = init_params(k_p, input_nf=F, output_nf=F, hidden_nf=H, deg=DEG)

    fwd = jax.jit(functools.partial(e_gcl_mask_forward, hidden_nf=H))
    h_out, coord_out, edge_attr_out = fwd(params, h, edge_index, coord, edge_mask=edge_mask)

    jax.block_until_ready(h_out)
    jax.block_until_ready(coord_out)
    assert h_out.shape == (N, F) and coord_out.shape == (N, 3)
    assert bool(jnp.all(jnp.isfinite(h_out)))
    print("KERNEL_OK")
</pallas_src>

<mosaic_0001>
module attributes {stable_mosaic.version = 11 : i64} {
  func.func @_edge_mlp_embed_kernel(%arg0: i32, %arg1: memref<56x32xf32, #tpu.memory_space<vmem>>, %arg2: memref<56x32xf32, #tpu.memory_space<vmem>>, %arg3: memref<56x16xf32, #tpu.memory_space<vmem>>, %arg4: memref<56x32xf32, #tpu.memory_space<vmem>>, %arg5: memref<32x128xbf16, #tpu.memory_space<vmem>>, %arg6: memref<32x128xbf16, #tpu.memory_space<vmem>>, %arg7: memref<16x128xbf16, #tpu.memory_space<vmem>>, %arg8: memref<32x128xbf16, #tpu.memory_space<vmem>>, %arg9: memref<1x128xf32, #tpu.memory_space<vmem>>, %arg10: memref<128x128xbf16, #tpu.memory_space<vmem>>, %arg11: memref<1x128xf32, #tpu.memory_space<vmem>>, %arg12: memref<128x128xbf16, #tpu.memory_space<vmem>>, %arg13: memref<56x1xf32, #tpu.memory_space<vmem>>, %arg14: memref<56x128xbf16, #tpu.memory_space<vmem>>) attributes {dimension_semantics = [#tpu.dimension_semantics<parallel>], iteration_bounds = array<i64: 1>, scalar_prefetch = 0 : i64, scratch_operands = 0 : i64, tpu.core_type = #tpu.core_type<tc>, window_params = [{transform_indices = @transform_0, window_bounds = array<i64: 56, 32>}, {transform_indices = @transform_1, window_bounds = array<i64: 56, 32>}, {transform_indices = @transform_2, window_bounds = array<i64: 56, 16>}, {transform_indices = @transform_3, window_bounds = array<i64: 56, 32>}, {pipeline_mode = #tpu.pipeline_mode<synchronous>, transform_indices = @transform_4, window_bounds = array<i64: 32, 128>}, {pipeline_mode = #tpu.pipeline_mode<synchronous>, transform_indices = @transform_5, window_bounds = array<i64: 32, 128>}, {pipeline_mode = #tpu.pipeline_mode<synchronous>, transform_indices = @transform_6, window_bounds = array<i64: 16, 128>}, {pipeline_mode = #tpu.pipeline_mode<synchronous>, transform_indices = @transform_7, window_bounds = array<i64: 32, 128>}, {pipeline_mode = #tpu.pipeline_mode<synchronous>, transform_indices = @transform_8, window_bounds = array<i64: 1, 128>}, {pipeline_mode = #tpu.pipeline_mode<synchronous>, transform_indices = @transform_9, window_bounds = array<i64: 128, 128>}, {pipeline_mode = #tpu.pipeline_mode<synchronous>, transform_indices = @transform_10, window_bounds = array<i64: 1, 128>}, {pipeline_mode = #tpu.pipeline_mode<synchronous>, transform_indices = @transform_11, window_bounds = array<i64: 128, 128>}, {transform_indices = @transform_12, window_bounds = array<i64: 56, 1>}, {transform_indices = @transform_13, window_bounds = array<i64: 56, 128>}]} {
    %c0 = arith.constant 0 : index
    %c0_0 = arith.constant 0 : index
    %0 = vector.load %arg9[%c0, %c0_0] : memref<1x128xf32, #tpu.memory_space<vmem>>, vector<1x128xf32>
    %c0_1 = arith.constant 0 : index
    %c0_2 = arith.constant 0 : index
    %1 = vector.load %arg1[%c0_1, %c0_2] : memref<56x32xf32, #tpu.memory_space<vmem>>, vector<56x32xf32>
    %2 = arith.truncf %1 : vector<56x32xf32> to vector<56x32xbf16>
    %c0_3 = arith.constant 0 : index
    %c0_4 = arith.constant 0 : index
    %3 = vector.load %arg5[%c0_3, %c0_4] : memref<32x128xbf16, #tpu.memory_space<vmem>>, vector<32x128xbf16>
    %cst = arith.constant dense<0.000000e+00> : vector<56x128xf32>
    %4 = tpu.matmul %2, %3, %cst {dimension_numbers = #tpu.dot_dimension_numbers<[1], [0], [0], [1], [0, 0, 1, 1], [], []>} : vector<56x32xbf16>, vector<32x128xbf16>, vector<56x128xf32> -> vector<56x128xf32>
    %5 = vector.broadcast %0 : vector<1x128xf32> to vector<56x128xf32>
    %6 = arith.addf %5, %4 : vector<56x128xf32>
    %c0_5 = arith.constant 0 : index
    %c0_6 = arith.constant 0 : index
    %7 = vector.load %arg2[%c0_5, %c0_6] : memref<56x32xf32, #tpu.memory_space<vmem>>, vector<56x32xf32>
    %8 = arith.truncf %7 : vector<56x32xf32> to vector<56x32xbf16>
    %c0_7 = arith.constant 0 : index
    %c0_8 = arith.constant 0 : index
    %9 = vector.load %arg6[%c0_7, %c0_8] : memref<32x128xbf16, #tpu.memory_space<vmem>>, vector<32x128xbf16>
    %cst_9 = arith.constant dense<0.000000e+00> : vector<56x128xf32>
    %10 = tpu.matmul %8, %9, %cst_9 {dimension_numbers = #tpu.dot_dimension_numbers<[1], [0], [0], [1], [0, 0, 1, 1], [], []>} : vector<56x32xbf16>, vector<32x128xbf16>, vector<56x128xf32> -> vector<56x128xf32>
    %11 = arith.addf %6, %10 : vector<56x128xf32>
    %c0_10 = arith.constant 0 : index
    %c0_11 = arith.constant 0 : index
    %12 = vector.load %arg3[%c0_10, %c0_11] : memref<56x16xf32, #tpu.memory_space<vmem>>, vector<56x16xf32>
    %13 = arith.truncf %12 : vector<56x16xf32> to vector<56x16xbf16>
    %c0_12 = arith.constant 0 : index
    %c0_13 = arith.constant 0 : index
    %14 = vector.load %arg7[%c0_12, %c0_13] : memref<16x128xbf16, #tpu.memory_space<vmem>>, vector<16x128xbf16>
    %cst_14 = arith.constant dense<0.000000e+00> : vector<56x128xf32>
    %15 = tpu.matmul %13, %14, %cst_14 {dimension_numbers = #tpu.dot_dimension_numbers<[1], [0], [0], [1], [0, 0, 1, 1], [], []>} : vector<56x16xbf16>, vector<16x128xbf16>, vector<56x128xf32> -> vector<56x128xf32>
    %16 = arith.addf %11, %15 : vector<56x128xf32>
    %c0_15 = arith.constant 0 : index
    %c0_16 = arith.constant 0 : index
    %17 = vector.load %arg4[%c0_15, %c0_16] : memref<56x32xf32, #tpu.memory_space<vmem>>, vector<56x32xf32>
    %18 = arith.truncf %17 : vector<56x32xf32> to vector<56x32xbf16>
    %c0_17 = arith.constant 0 : index
    %c0_18 = arith.constant 0 : index
    %19 = vector.load %arg8[%c0_17, %c0_18] : memref<32x128xbf16, #tpu.memory_space<vmem>>, vector<32x128xbf16>
    %cst_19 = arith.constant dense<0.000000e+00> : vector<56x128xf32>
    %20 = tpu.matmul %18, %19, %cst_19 {dimension_numbers = #tpu.dot_dimension_numbers<[1], [0], [0], [1], [0, 0, 1, 1], [], []>} : vector<56x32xbf16>, vector<32x128xbf16>, vector<56x128xf32> -> vector<56x128xf32>
    %21 = arith.addf %16, %20 : vector<56x128xf32>
    %cst_20 = arith.constant 0.000000e+00 : f32
    %22 = vector.broadcast %cst_20 : f32 to vector<56x128xf32>
    %23 = arith.maximumf %21, %22 : vector<56x128xf32>
    %24 = arith.truncf %23 : vector<56x128xf32> to vector<56x128xbf16>
    %c0_21 = arith.constant 0 : index
    %c0_22 = arith.constant 0 : index
    %25 = vector.load %arg10[%c0_21, %c0_22] : memref<128x128xbf16, #tpu.memory_space<vmem>>, vector<128x128xbf16>
    %cst_23 = arith.constant dense<0.000000e+00> : vector<56x128xf32>
    %26 = tpu.matmul %24, %25, %cst_23 {dimension_numbers = #tpu.dot_dimension_numbers<[1], [0], [0], [1], [0, 0, 1, 1], [], []>} : vector<56x128xbf16>, vector<128x128xbf16>, vector<56x128xf32> -> vector<56x128xf32>
    %c0_24 = arith.constant 0 : index
    %c0_25 = arith.constant 0 : index
    %27 = vector.load %arg11[%c0_24, %c0_25] : memref<1x128xf32, #tpu.memory_space<vmem>>, vector<1x128xf32>
    %28 = vector.broadcast %27 : vector<1x128xf32> to vector<56x128xf32>
    %29 = arith.addf %26, %28 : vector<56x128xf32>
    %cst_26 = arith.constant 0.000000e+00 : f32
    %30 = vector.broadcast %cst_26 : f32 to vector<56x128xf32>
    %31 = arith.maximumf %29, %30 : vector<56x128xf32>
    %32 = arith.truncf %31 : vector<56x128xf32> to vector<56x128xbf16>
    %c0_27 = arith.constant 0 : index
    %c0_28 = arith.constant 0 : index
    %33 = vector.load %arg12[%c0_27, %c0_28] : memref<128x128xbf16, #tpu.memory_space<vmem>>, vector<128x128xbf16>
    %cst_29 = arith.constant dense<0.000000e+00> : vector<56x128xf32>
    %34 = tpu.matmul %32, %33, %cst_29 {dimension_numbers = #tpu.dot_dimension_numbers<[1], [0], [0], [1], [0, 0, 1, 1], [], []>} : vector<56x128xbf16>, vector<128x128xbf16>, vector<56x128xf32> -> vector<56x128xf32>
    %c0_30 = arith.constant 0 : index
    %c0_31 = arith.constant 0 : index
    %35 = vector.load %arg13[%c0_30, %c0_31] : memref<56x1xf32, #tpu.memory_space<vmem>>, vector<56x1xf32>
    %36 = vector.broadcast %35 : vector<56x1xf32> to vector<56x128xf32>
    %37 = arith.mulf %34, %36 : vector<56x128xf32>
    %38 = arith.truncf %37 : vector<56x128xf32> to vector<56x128xbf16>
    %c0_32 = arith.constant 0 : index
    %c0_33 = arith.constant 0 : index
    %39 = vector.load %arg14[%c0_32, %c0_33] : memref<56x128xbf16, #tpu.memory_space<vmem>>, vector<56x128xbf16>
    tpu.vector_store %arg14[%c0_32, %c0_33], %38 {strides = array<i32>} : memref<56x128xbf16, #tpu.memory_space<vmem>>, vector<56x128xbf16>,
    return
  }
  func.func @transform_0(%arg0: i32) -> (i32, i32) {
    %c0_i32 = arith.constant 0 : i32
    %c0_i32_0 = arith.constant 0 : i32
    return %arg0, %c0_i32 : i32, i32
  }
  func.func @transform_1(%arg0: i32) -> (i32, i32) {
    %c0_i32 = arith.constant 0 : i32
    %c0_i32_0 = arith.constant 0 : i32
    return %arg0, %c0_i32 : i32, i32
  }
  func.func @transform_2(%arg0: i32) -> (i32, i32) {
    %c0_i32 = arith.constant 0 : i32
    %c0_i32_0 = arith.constant 0 : i32
    return %arg0, %c0_i32 : i32, i32
  }
  func.func @transform_3(%arg0: i32) -> (i32, i32) {
    %c0_i32 = arith.constant 0 : i32
    %c0_i32_0 = arith.constant 0 : i32
    return %arg0, %c0_i32 : i32, i32
  }
  func.func @transform_4(%arg0: i32) -> (i32, i32) {
    %c0_i32 = arith.constant 0 : i32
    %c0_i32_0 = arith.constant 0 : i32
    %c0_i32_1 = arith.constant 0 : i32
    return %c0_i32, %c0_i32_0 : i32, i32
  }
  func.func @transform_5(%arg0: i32) -> (i32, i32) {
    %c0_i32 = arith.constant 0 : i32
    %c0_i32_0 = arith.constant 0 : i32
    %c0_i32_1 = arith.constant 0 : i32
    return %c0_i32, %c0_i32_0 : i32, i32
  }
  func.func @transform_6(%arg0: i32) -> (i32, i32) {
    %c0_i32 = arith.constant 0 : i32
    %c0_i32_0 = arith.constant 0 : i32
    %c0_i32_1 = arith.constant 0 : i32
    return %c0_i32, %c0_i32_0 : i32, i32
  }
  func.func @transform_7(%arg0: i32) -> (i32, i32) {
    %c0_i32 = arith.constant 0 : i32
    %c0_i32_0 = arith.constant 0 : i32
    %c0_i32_1 = arith.constant 0 : i32
    return %c0_i32, %c0_i32_0 : i32, i32
  }
  func.func @transform_8(%arg0: i32) -> (i32, i32) {
    %c0_i32 = arith.constant 0 : i32
    %c0_i32_0 = arith.constant 0 : i32
    %c0_i32_1 = arith.constant 0 : i32
    return %c0_i32, %c0_i32_0 : i32, i32
  }
  func.func @transform_9(%arg0: i32) -> (i32, i32) {
    %c0_i32 = arith.constant 0 : i32
    %c0_i32_0 = arith.constant 0 : i32
    %c0_i32_1 = arith.constant 0 : i32
    return %c0_i32, %c0_i32_0 : i32, i32
  }
  func.func @transform_10(%arg0: i32) -> (i32, i32) {
    %c0_i32 = arith.constant 0 : i32
    %c0_i32_0 = arith.constant 0 : i32
    %c0_i32_1 = arith.constant 0 : i32
    return %c0_i32, %c0_i32_0 : i32, i32
  }
  func.func @transform_11(%arg0: i32) -> (i32, i32) {
    %c0_i32 = arith.constant 0 : i32
    %c0_i32_0 = arith.constant 0 : i32
    %c0_i32_1 = arith.constant 0 : i32
    return %c0_i32, %c0_i32_0 : i32, i32
  }
  func.func @transform_12(%arg0: i32) -> (i32, i32) {
    %c0_i32 = arith.constant 0 : i32
    %c0_i32_0 = arith.constant 0 : i32
    return %arg0, %c0_i32 : i32, i32
  }
  func.func @transform_13(%arg0: i32) -> (i32, i32) {
    %c0_i32 = arith.constant 0 : i32
    %c0_i32_0 = arith.constant 0 : i32
    return %arg0, %c0_i32 : i32, i32
  }
}

module attributes {stable_mosaic.version = 11 : i64} {
  func.func @_node_mlp_kernel(%arg0: i32, %arg1: memref<8x32xf32, #tpu.memory_space<vmem>>, %arg2: memref<8x32xf32, #tpu.memory_space<vmem>>, %arg3: memref<32x128xbf16, #tpu.memory_space<vmem>>, %arg4: memref<32x128xbf16, #tpu.memory_space<vmem>>, %arg5: memref<1x128xf32, #tpu.memory_space<vmem>>, %arg6: memref<128x128xbf16, #tpu.memory_space<vmem>>, %arg7: memref<1x128xf32, #tpu.memory_space<vmem>>, %arg8: memref<8x128xf32, #tpu.memory_space<vmem>>) attributes {dimension_semantics = [#tpu.dimension_semantics<parallel>], iteration_bounds = array<i64: 1>, scalar_prefetch = 0 : i64, scratch_operands = 0 : i64, tpu.core_type = #tpu.core_type<tc>, window_params = [{transform_indices = @transform_0, window_bounds = array<i64: 8, 32>}, {transform_indices = @transform_1, window_bounds = array<i64: 8, 32>}, {pipeline_mode = #tpu.pipeline_mode<synchronous>, transform_indices = @transform_2, window_bounds = array<i64: 32, 128>}, {pipeline_mode = #tpu.pipeline_mode<synchronous>, transform_indices = @transform_3, window_bounds = array<i64: 32, 128>}, {pipeline_mode = #tpu.pipeline_mode<synchronous>, transform_indices = @transform_4, window_bounds = array<i64: 1, 128>}, {pipeline_mode = #tpu.pipeline_mode<synchronous>, transform_indices = @transform_5, window_bounds = array<i64: 128, 128>}, {pipeline_mode = #tpu.pipeline_mode<synchronous>, transform_indices = @transform_6, window_bounds = array<i64: 1, 128>}, {transform_indices = @transform_7, window_bounds = array<i64: 8, 128>}]} {
    %c0 = arith.constant 0 : index
    %c0_0 = arith.constant 0 : index
    %0 = vector.load %arg5[%c0, %c0_0] : memref<1x128xf32, #tpu.memory_space<vmem>>, vector<1x128xf32>
    %c0_1 = arith.constant 0 : index
    %c0_2 = arith.constant 0 : index
    %1 = vector.load %arg1[%c0_1, %c0_2] : memref<8x32xf32, #tpu.memory_space<vmem>>, vector<8x32xf32>
    %2 = arith.truncf %1 : vector<8x32xf32> to vector<8x32xbf16>
    %c0_3 = arith.constant 0 : index
    %c0_4 = arith.constant 0 : index
    %3 = vector.load %arg3[%c0_3, %c0_4] : memref<32x128xbf16, #tpu.memory_space<vmem>>, vector<32x128xbf16>
    %cst = arith.constant dense<0.000000e+00> : vector<8x128xf32>
    %4 = tpu.matmul %2, %3, %cst {dimension_numbers = #tpu.dot_dimension_numbers<[1], [0], [0], [1], [0, 0, 1, 1], [], []>} : vector<8x32xbf16>, vector<32x128xbf16>, vector<8x128xf32> -> vector<8x128xf32>
    %5 = vector.broadcast %0 : vector<1x128xf32> to vector<8x128xf32>
    %6 = arith.addf %5, %4 : vector<8x128xf32>
    %c0_5 = arith.constant 0 : index
    %c0_6 = arith.constant 0 : index
    %7 = vector.load %arg2[%c0_5, %c0_6] : memref<8x32xf32, #tpu.memory_space<vmem>>, vector<8x32xf32>
    %8 = arith.truncf %7 : vector<8x32xf32> to vector<8x32xbf16>
    %c0_7 = arith.constant 0 : index
    %c0_8 = arith.constant 0 : index
    %9 = vector.load %arg4[%c0_7, %c0_8] : memref<32x128xbf16, #tpu.memory_space<vmem>>, vector<32x128xbf16>
    %cst_9 = arith.constant dense<0.000000e+00> : vector<8x128xf32>
    %10 = tpu.matmul %8, %9, %cst_9 {dimension_numbers = #tpu.dot_dimension_numbers<[1], [0], [0], [1], [0, 0, 1, 1], [], []>} : vector<8x32xbf16>, vector<32x128xbf16>, vector<8x128xf32> -> vector<8x128xf32>
    %11 = arith.addf %6, %10 : vector<8x128xf32>
    %cst_10 = arith.constant 0.000000e+00 : f32
    %12 = vector.broadcast %cst_10 : f32 to vector<8x128xf32>
    %13 = arith.maximumf %11, %12 : vector<8x128xf32>
    %14 = arith.truncf %13 : vector<8x128xf32> to vector<8x128xbf16>
    %c0_11 = arith.constant 0 : index
    %c0_12 = arith.constant 0 : index
    %15 = vector.load %arg6[%c0_11, %c0_12] : memref<128x128xbf16, #tpu.memory_space<vmem>>, vector<128x128xbf16>
    %cst_13 = arith.constant dense<0.000000e+00> : vector<8x128xf32>
    %16 = tpu.matmul %14, %15, %cst_13 {dimension_numbers = #tpu.dot_dimension_numbers<[1], [0], [0], [1], [0, 0, 1, 1], [], []>} : vector<8x128xbf16>, vector<128x128xbf16>, vector<8x128xf32> -> vector<8x128xf32>
    %c0_14 = arith.constant 0 : index
    %c0_15 = arith.constant 0 : index
    %17 = vector.load %arg7[%c0_14, %c0_15] : memref<1x128xf32, #tpu.memory_space<vmem>>, vector<1x128xf32>
    %18 = vector.broadcast %17 : vector<1x128xf32> to vector<8x128xf32>
    %19 = arith.addf %16, %18 : vector<8x128xf32>
    %c0_16 = arith.constant 0 : index
    %c0_17 = arith.constant 0 : index
    %20 = vector.load %arg1[%c0_16, %c0_17] : memref<8x32xf32, #tpu.memory_space<vmem>>, vector<8x32xf32>
    %21 = vector.extract_strided_slice %19 {offsets = [0, 0], sizes = [8, 32], strides = [1, 1]} : vector<8x128xf32> to vector<8x32xf32>
    %22 = arith.addf %21, %20 : vector<8x32xf32>
    %c0_18 = arith.constant 0 : index
    %c0_19 = arith.constant 0 : index
    %23 = vector.load %arg8[%c0_18, %c0_19] : memref<8x128xf32, #tpu.memory_space<vmem>>, vector<8x32xf32>
    tpu.vector_store %arg8[%c0_18, %c0_19], %22 {strides = array<i32>} : memref<8x128xf32, #tpu.memory_space<vmem>>, vector<8x32xf32>,
    %24 = vector.extract_strided_slice %19 {offsets = [0, 32], sizes = [8, 96], strides = [1, 1]} : vector<8x128xf32> to vector<8x96xf32>
    %c0_20 = arith.constant 0 : index
    %c32 = arith.constant 32 : index
    %25 = vector.load %arg8[%c0_20, %c32] : memref<8x128xf32, #tpu.memory_space<vmem>>, vector<8x96xf32>
    tpu.vector_store %arg8[%c0_20, %c32], %24 {strides = array<i32>} : memref<8x128xf32, #tpu.memory_space<vmem>>, vector<8x96xf32>,
    return
  }
  func.func @transform_0(%arg0: i32) -> (i32, i32) {
    %c0_i32 = arith.constant 0 : i32
    %c0_i32_0 = arith.constant 0 : i32
    return %arg0, %c0_i32 : i32, i32
  }
  func.func @transform_1(%arg0: i32) -> (i32, i32) {
    %c0_i32 = arith.constant 0 : i32
    %c0_i32_0 = arith.constant 0 : i32
    return %arg0, %c0_i32 : i32, i32
  }
  func.func @transform_2(%arg0: i32) -> (i32, i32) {
    %c0_i32 = arith.constant 0 : i32
    %c0_i32_0 = arith.constant 0 : i32
    %c0_i32_1 = arith.constant 0 : i32
    return %c0_i32, %c0_i32_0 : i32, i32
  }
  func.func @transform_3(%arg0: i32) -> (i32, i32) {
    %c0_i32 = arith.constant 0 : i32
    %c0_i32_0 = arith.constant 0 : i32
    %c0_i32_1 = arith.constant 0 : i32
    return %c0_i32, %c0_i32_0 : i32, i32
  }
  func.func @transform_4(%arg0: i32) -> (i32, i32) {
    %c0_i32 = arith.constant 0 : i32
    %c0_i32_0 = arith.constant 0 : i32
    %c0_i32_1 = arith.constant 0 : i32
    return %c0_i32, %c0_i32_0 : i32, i32
  }
  func.func @transform_5(%arg0: i32) -> (i32, i32) {
    %c0_i32 = arith.constant 0 : i32
    %c0_i32_0 = arith.constant 0 : i32
    %c0_i32_1 = arith.constant 0 : i32
    return %c0_i32, %c0_i32_0 : i32, i32
  }
  func.func @transform_6(%arg0: i32) -> (i32, i32) {
    %c0_i32 = arith.constant 0 : i32
    %c0_i32_0 = arith.constant 0 : i32
    %c0_i32_1 = arith.constant 0 : i32
    return %c0_i32, %c0_i32_0 : i32, i32
  }
  func.func @transform_7(%arg0: i32) -> (i32, i32) {
    %c0_i32 = arith.constant 0 : i32
    %c0_i32_0 = arith.constant 0 : i32
    return %arg0, %c0_i32 : i32, i32
  }
}

</mosaic_0001>

<bundles_post_ra>
// kernel: e_gcl_mask_forward.3
= control target key start
LH: loop header
LB: loop body
LE: loop exit
PB: predicated region body
PF: predicated region fallthrough
CT: control target
= control target key end

     0   :  { %s392_s0 = inlined_call_operand.vmem [shape: f32[8,32], index: 0, kind: input, shape index: {}]   ;;  %s393_s1 = inlined_call_operand.vmem [shape: f32[8,32], index: 1, kind: input, shape index: {}]   ;;  %s394_s2 = inlined_call_operand.vmem [shape: bf16[32,128], index: 2, kind: input, shape index: {}]   ;;  %s395_s3 = inlined_call_operand.vmem [shape: bf16[32,128], index: 3, kind: input, shape index: {}]   ;;  %s396_s4 = inlined_call_operand.vmem [shape: f32[1,128], index: 4, kind: input, shape index: {}]   ;;  %s397_s5 = inlined_call_operand.vmem [shape: bf16[128,128], index: 5, kind: input, shape index: {}]   ;;  %s398_s6 = inlined_call_operand.vmem [shape: f32[1,128], index: 6, kind: input, shape index: {}]   ;;  %s399_s7 = inlined_call_operand.hbm [shape: f32[8,128], index: 7, kind: output, shape index: {}]  }
   0x1   :  { %v257_v0 = vld [vmem:[%s394_s2 + $0x8] sm:$0xff]  ;;  %v256_v2 = vld [vmem:[%s394_s2] sm:$0xff]  ;;  %v267_v6 = vld [vmem:[%s397_s5 + $0x38] sm:$0xff] }
   0x2   :  { %v259_v1 = vld [vmem:[%s395_s3 + $0x8] sm:$0xff]  ;;  %v258_v3 = vld [vmem:[%s395_s3] sm:$0xff]  ;;  %57 = vmatpush.bf16.msra.mxu0 %v257_v0  ;;  %v266_v7 = vld [vmem:[%s397_s5 + $0x30] sm:$0xff]  ;;  %173 = vmatpush.bf16.msra.mxu2 %v267_v6 }
   0x3   :  { %95 = vmatpush.bf16.msra.mxu1 %v259_v1  ;;  %v29_v4 = vld [vmem:[%s392_s0] sm:$0xff] }
   0x4   :  { %v68_v5 = vld [vmem:[%s393_s1] sm:$0xff] }
   0x5   :  { %12 = vsyncpa [#allocation3], 0  ;;  %v30_v8 = vpack.c.bf16 %v29_v4, %v29_v4  ;;  %v69_v9 = vpack.c.bf16 %v68_v5, %v68_v5  ;;  %vm47_vm0 = vcmask 261120   ;;  %v265_v10 = vld [vmem:[%s397_s5 + $0x28] sm:$0xff]  ;;  %v264_v11 = vld [vmem:[%s397_s5 + $0x20] sm:$0xff]  ;;  %vm188_vm1 = vcmask 1047808  }
   0x6   :  { %58 = vmatpush.bf16.msra.mxu0 %v256_v2  ;;  %174 = vmatpush.bf16.msra.mxu2 %v266_v7  ;;  %v263_v12 = vld [vmem:[%s397_s5 + $0x18] sm:$0xff]  ;;  %v262_v13 = vld [vmem:[%s397_s5 + $0x10] sm:$0xff]  ;;  %v261_v14 = vld [vmem:[%s397_s5 + $0x8] sm:$0xff] }
   0x7   :  { %96 = vmatpush.bf16.msra.mxu1 %v258_v3  ;;  %v260_v15 = vld [vmem:[%s397_s5] sm:$0xff]  ;;  %s297_s5 = smov [#allocation2]  }
   0x8   :  { %v269_v16 = vld [vmem:[%s396_s4] ss:$0 sm:$0xff]  ;;  %s195_s29 = sshll.u32 %s297_s5, 4  ;;  %s197_s4 = sshll.u32 %s399_s7, 4  ;;  %s196_s29 = int_to_ptr.vmem [resolvable:$true] %s195_s29  ;;  %s198_s4 = int_to_ptr.hbm [resolvable:$true] %s197_s4 }
   0x9   :  { %214 = vmatmul.msk.bf16.vlgmr.msra.gmra.mxu0 %vm47_vm0, %v30_v8  ;;  %v270_v25 = vld [vmem:[%s398_s6] ss:$0 sm:$0xff] }
   0xa   :  { %223 = vmatmul.msk.bf16.vlgmr.msra.gmra.mxu1 %vm47_vm0, %v69_v9  ;;  %175 = vmatpush.bf16.msra.mxu2 %v265_v10 }
   0xe   :  { %176 = vmatpush.bf16.msra.mxu2 %v264_v11 }
  0x12   :  { %177 = vmatpush.bf16.msra.mxu2 %v263_v12 }
  0x16   :  { %178 = vmatpush.bf16.msra.mxu2 %v262_v13 }
  0x1a   :  { %179 = vmatpush.bf16.msra.mxu2 %v261_v14 }
  0x1e   :  { %180 = vmatpush.bf16.msra.mxu2 %v260_v15 }
  0x86   :  { %v60_v17 = vpop.f32.mrf.mxu0 }
  0x87   :  { %v98_v18 = vpop.f32.mrf.mxu1  ;;  %v67_v19 = vadd.f32 %v269_v16, %v60_v17 }
  0x89   :  { %v102_v20 = vadd.f32 %v98_v18, %v67_v19 }
  0x8b   :  { %v103_v21 = vmax.f32 %v102_v20, 0.0 }
  0x8d   :  { %v104_v22 = vpack.c.bf16 %v103_v21, %v103_v21 }
  0x8e   :  { %v62_v23 = vpop.f32.mrf.mxu0 }
  0x8f   :  { %v100_v24 = vpop.f32.mrf.mxu1  ;;  %181 = vmatmul.bf16.vlgmr.msra.gmra.mxu2 %v104_v22 }
 0x112   :  { %v182_v26 = vpop.f32.mrf.mxu2 }
 0x113   :  { %v183_v27 = vadd.f32 %v270_v25, %v182_v26 }
 0x115   :  { %v186_v28 = vadd.f32 %v183_v27, %v29_v4 }
 0x117   :  { %187 = vst.msk [vmem:[#allocation2] sm:$0xff] %vm47_vm0, %v186_v28 }
 0x118   :  { %189 = vst.msk [vmem:[#allocation2] sm:$0xff] %vm188_vm1, %v183_v27 }
 0x119   :  { %200 = dma.vmem_to_hbm [thread:$0]  %s196_s29, 128, %s198_s4, [#allocation3]  }
 0x11a   :  { %v184_v29 = vpop.f32.mrf.mxu2 }
 0x11b   :  { %295 = dma.done.wait [#allocation3], 128  }
 0x11c   :  { %296 = vsyncadd [#allocation3], 4294967168 }
 0x11d   :  { %205 = vsyncpa [#allocation3], 1 }

// kernel: e_gcl_mask_forward.2
= control target key start
LH: loop header
LB: loop body
LE: loop exit
PB: predicated region body
PF: predicated region fallthrough
CT: control target
= control target key end

     0   :  { %vm217_vm0 = vcmask 130048   ;;  %vm73_vm1 = vcmask 261120   ;;  %s1061_s4 = inlined_call_operand.vmem [shape: bf16[32,128], index: 4, kind: input, shape index: {}]   ;;  %s1062_s6 = inlined_call_operand.vmem [shape: bf16[16,128], index: 6, kind: input, shape index: {}]   ;;  %s1063_s2 = inlined_call_operand.vmem [shape: f32[56,16], index: 2, kind: input, shape index: {}]   ;;  %s1064_s7 = inlined_call_operand.vmem [shape: bf16[32,128], index: 7, kind: input, shape index: {}]   ;;  %s1065_s0 = inlined_call_operand.vmem [shape: f32[56,32], index: 0, kind: input, shape index: {}]   ;;  %s1066_s5 = inlined_call_operand.vmem [shape: bf16[32,128], index: 5, kind: input, shape index: {}]   ;;  %s1067_s8 = inlined_call_operand.vmem [shape: f32[1,128], index: 8, kind: input, shape index: {}]   ;;  %s1068_s3 = inlined_call_operand.vmem [shape: f32[56,32], index: 3, kind: input, shape index: {}]   ;;  %s1069_s1 = inlined_call_operand.vmem [shape: f32[56,32], index: 1, kind: input, shape index: {}]   ;;  %s1070_s10 = inlined_call_operand.vmem [shape: f32[1,128], index: 10, kind: input, shape index: {}]   ;;  %s1071_s9 = inlined_call_operand.vmem [shape: bf16[128,128], index: 9, kind: input, shape index: {}]   ;;  %s1072_s11 = inlined_call_operand.vmem [shape: bf16[128,128], index: 11, kind: input, shape index: {}]   ;;  %s1073_s12 = inlined_call_operand.vmem [shape: f32[56,1], index: 12, kind: input, shape index: {}]   ;;  %s1074_s13 = inlined_call_operand.vmem [shape: bf16[56,128], index: 13, kind: output, shape index: {}]  }
   0x1   :  { %v725_v0 = vld [vmem:[%s1061_s4 + $0x8] sm:$0xff]  ;;  %v728_v1 = vld [vmem:[%s1062_s6] sm:$0xff]  ;;  %v204_v19 = vld [vmem:[%s1063_s2 + $0x30] sm:$0xff] }
   0x2   :  { %v202_v2 = vld [vmem:[%s1063_s2 + $0x20] sm:$0xff]  ;;  %v203_v3 = vld [vmem:[%s1063_s2 + $0x28] sm:$0xff]  ;;  %764 = vmatpush.bf16.msra.mxu1 %v725_v0  ;;  %766 = vmatpush.bf16.msra.mxu3 %v728_v1  ;;  %v208_v20 = vpack.c.bf16 %v204_v19, %v204_v19  ;;  %v200_v21 = vld [vmem:[%s1063_s2 + $0x10] sm:$0xff] }
   0x3   :  { %v730_v4 = vld [vmem:[%s1064_s7 + $0x8] sm:$0xff]  ;;  %v207_v5 = vpack.c.bf16 %v203_v3, %v202_v2  ;;  %v724_v6 = vld [vmem:[%s1061_s4] sm:$0xff]  ;;  %92 = vmatpush.bf16.msra.mxu0 %v725_v0  ;;  %237 = vmatpush.bf16.msra.mxu2 %v728_v1  ;;  %v201_v22 = vld [vmem:[%s1063_s2 + $0x18] sm:$0xff] }
   0x4   :  { %v50_v7 = vld [vmem:[%s1065_s0 + $0x20] sm:$0xff]  ;;  %v51_v8 = vld [vmem:[%s1065_s0 + $0x28] sm:$0xff]  ;;  %v52_v23 = vld [vmem:[%s1065_s0 + $0x30] sm:$0xff]  ;;  %v206_v24 = vpack.c.bf16 %v201_v22, %v200_v21 }
   0x5   :  { %v727_v9 = vld [vmem:[%s1066_s5 + $0x8] sm:$0xff]  ;;  %v729_v10 = vld [vmem:[%s1064_s7] sm:$0xff]  ;;  %646 = vmatmul.msk.bf16.vlgmr.msra.gmra.mxu3 %vm217_vm0, %v207_v5  ;;  %v55_v13 = vpack.c.bf16 %v51_v8, %v50_v7  ;;  %v48_v25 = vld [vmem:[%s1065_s0 + $0x10] sm:$0xff]  ;;  %v56_v27 = vpack.c.bf16 %v52_v23, %v52_v23 }
   0x6   :  { %310 = vmatpush.bf16.msrb.mxu3 %v730_v4  ;;  %v198_v11 = vld [vmem:[%s1063_s2] sm:$0xff]  ;;  %v199_v12 = vld [vmem:[%s1063_s2 + $0x8] sm:$0xff]  ;;  %765 = vmatpush.bf16.msra.mxu1 %v724_v6  ;;  %v49_v26 = vld [vmem:[%s1065_s0 + $0x18] sm:$0xff] }
   0x7   :  { %v205_v14 = vpack.c.bf16 %v199_v12, %v198_v11  ;;  %v46_v15 = vld [vmem:[%s1065_s0] sm:$0xff]  ;;  %v47_v16 = vld [vmem:[%s1065_s0 + $0x8] sm:$0xff]  ;;  %93 = vmatpush.bf16.msra.mxu0 %v724_v6  ;;  %v54_v28 = vpack.c.bf16 %v49_v26, %v48_v25  ;;  %v267_v35 = vld [vmem:[%s1068_s3 + $0x10] sm:$0xff] }
   0x8   :  { %v726_v17 = vld [vmem:[%s1066_s5] sm:$0xff]  ;;  %v53_v18 = vpack.c.bf16 %v47_v16, %v46_v15  ;;  %v266_v30 = vld [vmem:[%s1068_s3 + $0x8] sm:$0xff]  ;;  %v268_v36 = vld [vmem:[%s1068_s3 + $0x18] sm:$0xff] }
   0x9   :  { %644 = vmatmul.msk.bf16.vlgmr.msra.gmra.mxu2 %vm217_vm0, %v205_v14  ;;  %626 = vmatmul.msk.bf16.vlgmr.msra.gmra.mxu1 %vm73_vm1, %v55_v13  ;;  %v265_v29 = vld [vmem:[%s1068_s3] sm:$0xff]  ;;  %v125_v33 = vld [vmem:[%s1069_s1 + $0x8] sm:$0xff]  ;;  %v273_v37 = vpack.c.bf16 %v268_v36, %v267_v35  ;;  %v126_v38 = vld [vmem:[%s1069_s1 + $0x10] sm:$0xff] }
   0xa   :  { %169 = vmatpush.bf16.msrb.mxu1 %v727_v9  ;;  %311 = vmatpush.bf16.msrb.mxu3 %v729_v10  ;;  %v272_v31 = vpack.c.bf16 %v266_v30, %v265_v29  ;;  %v124_v32 = vld [vmem:[%s1069_s1] sm:$0xff]  ;;  %v127_v39 = vld [vmem:[%s1069_s1 + $0x18] sm:$0xff]  ;;  %v270_v42 = vld [vmem:[%s1068_s3 + $0x28] sm:$0xff] }
   0xb   :  { %624 = vmatmul.msk.bf16.vlgmr.msra.gmra.mxu0 %vm73_vm1, %v53_v18  ;;  %v131_v34 = vpack.c.bf16 %v125_v33, %v124_v32  ;;  %v132_v40 = vpack.c.bf16 %v127_v39, %v126_v38  ;;  %v269_v41 = vld [vmem:[%s1068_s3 + $0x20] sm:$0xff]  ;;  %v129_v45 = vld [vmem:[%s1069_s1 + $0x28] sm:$0xff]  ;;  %v271_v47 = vld [vmem:[%s1068_s3 + $0x30] sm:$0xff] }
   0xc   :  { %v274_v43 = vpack.c.bf16 %v270_v42, %v269_v41  ;;  %v128_v44 = vld [vmem:[%s1069_s1 + $0x20] sm:$0xff]  ;;  %v275_v48 = vpack.c.bf16 %v271_v47, %v271_v47  ;;  %v130_v49 = vld [vmem:[%s1069_s1 + $0x30] sm:$0xff]  ;;  %v738_v51 = vld [vmem:[%s1071_s9 + $0x38] sm:$0xff] }
   0xd   :  { %v133_v46 = vpack.c.bf16 %v129_v45, %v128_v44  ;;  %v134_v50 = vpack.c.bf16 %v130_v49, %v130_v49  ;;  %418 = vmatpush.bf16.msrb.mxu2 %v738_v51  ;;  %v737_v52 = vld [vmem:[%s1071_s9 + $0x30] sm:$0xff]  ;;  %v736_v53 = vld [vmem:[%s1071_s9 + $0x28] sm:$0xff]  ;;  %v735_v54 = vld [vmem:[%s1071_s9 + $0x20] sm:$0xff] }
   0xe   :  { %170 = vmatpush.bf16.msrb.mxu1 %v726_v17  ;;  %v734_v57 = vld [vmem:[%s1071_s9 + $0x18] sm:$0xff]  ;;  %v733_v58 = vld [vmem:[%s1071_s9 + $0x10] sm:$0xff]  ;;  %v732_v61 = vld [vmem:[%s1071_s9 + $0x8] sm:$0xff] }
   0xf   :  { %v731_v62 = vld [vmem:[%s1071_s9] sm:$0xff]  ;;  %v746_v47 = vld [vmem:[%s1072_s11 + $0x38] sm:$0xff] }
  0x10   :  { %v771_v5 = vld [vmem:[%s1067_s8] ss:$0 sm:$0xff]  ;;  %521 = vmatpush.bf16.msrb.mxu0 %v746_v47 }
  0x11   :  { %419 = vmatpush.bf16.msrb.mxu2 %v737_v52  ;;  %v744_v52 = vld [vmem:[%s1072_s11 + $0x28] sm:$0xff] }
  0x15   :  { %647 = vmatmul.msk.bf16.gmra.mxu3 %vm217_vm0, %v208_v20  ;;  %420 = vmatpush.bf16.msrb.mxu2 %v736_v53 }
  0x19   :  { %645 = vmatmul.msk.bf16.gmra.mxu2 %vm217_vm0, %v206_v24  ;;  %627 = vmatmul.msk.bf16.gmra.mxu1 %vm73_vm1, %v56_v27 }
  0x1a   :  { %421 = vmatpush.bf16.msrb.mxu2 %v735_v54 }
  0x1b   :  { %625 = vmatmul.msk.bf16.gmra.mxu0 %vm73_vm1, %v54_v28 }
  0x1e   :  { %422 = vmatpush.bf16.msrb.mxu2 %v734_v57  ;;  %v743_v57 = vld [vmem:[%s1072_s11 + $0x20] sm:$0xff] }
  0x22   :  { %423 = vmatpush.bf16.msrb.mxu2 %v733_v58 }
  0x25   :  { %656 = vmatmul.msk.bf16.vlgmr.msrb.gmra.mxu3 %vm73_vm1, %v272_v31 }
  0x26   :  { %424 = vmatpush.bf16.msrb.mxu2 %v732_v61 }
  0x29   :  { %636 = vmatmul.msk.bf16.vlgmr.msrb.gmra.mxu1 %vm73_vm1, %v131_v34 }
  0x2a   :  { %425 = vmatpush.bf16.msrb.mxu2 %v731_v62 }
  0x35   :  { %657 = vmatmul.msk.bf16.gmra.mxu3 %vm73_vm1, %v273_v37 }
  0x39   :  { %637 = vmatmul.msk.bf16.gmra.mxu1 %vm73_vm1, %v132_v40 }
  0x45   :  { %658 = vmatmul.msk.bf16.gmra.mxu3 %vm73_vm1, %v274_v43 }
  0x49   :  { %638 = vmatmul.msk.bf16.gmra.mxu1 %vm73_vm1, %v133_v46 }
  0x55   :  { %659 = vmatmul.msk.bf16.gmra.mxu3 %vm73_vm1, %v275_v48  ;;  %v745_v48 = vld [vmem:[%s1072_s11 + $0x30] sm:$0xff] }
  0x56   :  { %522 = vmatpush.bf16.msrb.mxu0 %v745_v48 }
  0x59   :  { %639 = vmatmul.msk.bf16.gmra.mxu1 %vm73_vm1, %v134_v50 }
  0x5a   :  { %523 = vmatpush.bf16.msrb.mxu0 %v744_v52 }
  0x5e   :  { %524 = vmatpush.bf16.msrb.mxu0 %v743_v57 }
  0x86   :  { %v105_v55 = vpop.f32.mrf.mxu1 }
  0x87   :  { %v121_v39 = vadd.f32 %v771_v5, %v105_v55 }
  0x88   :  { %v249_v56 = vpop.f32.mrf.mxu3  ;;  %v95_v1 = vpop.f32.mrf.mxu0 }
  0x89   :  { %v117_v6 = vadd.f32 %v771_v5, %v95_v1 }
  0x8c   :  { %v239_v4 = vpop.f32.mrf.mxu2 }
  0x8e   :  { %v107_v59 = vpop.f32.mrf.mxu1 }
  0x8f   :  { %v122_v49 = vadd.f32 %v771_v5, %v107_v59 }
  0x90   :  { %v983_v60 = vpop.f32.mrf.mxu3  ;;  %v97_v7 = vpop.f32.mrf.mxu0 }
  0x91   :  { %v118_v12 = vadd.f32 %v771_v5, %v97_v7 }
  0x94   :  { %v241_v11 = vpop.f32.mrf.mxu2 }
  0x96   :  { %v991_v63 = vpop.f32.mrf.mxu1 }
  0x97   :  { %v123_v58 = vadd.f32 %v771_v5, %v991_v63 }
  0x98   :  { %v993_v0 = vpop.f32.mrf.mxu3  ;;  %v100_v16 = vpop.f32.mrf.mxu0 }
  0x99   :  { %v119_v22 = vadd.f32 %v771_v5, %v100_v16 }
  0x9c   :  { %v244_v24 = vpop.f32.mrf.mxu2 }
  0x9e   :  { %v112_v2 = vpop.f32.mrf.mxu1 }
  0xa0   :  { %v256_v3 = vpop.f32.mrf.mxu3  ;;  %v102_v29 = vpop.f32.mrf.mxu0 }
  0xa1   :  { %v120_v30 = vadd.f32 %v771_v5, %v102_v29  ;;  %v742_v3 = vld [vmem:[%s1072_s11 + $0x18] sm:$0xff]  ;;  %v741_v5 = vld [vmem:[%s1072_s11 + $0x10] sm:$0xff] }
  0xa2   :  { %525 = vmatpush.bf16.msrb.mxu0 %v742_v3 }
  0xa4   :  { %v246_v34 = vpop.f32.mrf.mxu2 }
  0xa6   :  { %v172_v8 = vpop.f32.mrf.mxu1  ;;  %526 = vmatpush.bf16.msrb.mxu0 %v741_v5 }
  0xa7   :  { %v191_v10 = vadd.f32 %v172_v8, %v117_v6 }
  0xa8   :  { %v313_v9 = vpop.f32.mrf.mxu3 }
  0xa9   :  { %v258_v13 = vadd.f32 %v239_v4, %v191_v10  ;;  %v740_v10 = vld [vmem:[%s1072_s11 + $0x8] sm:$0xff] }
  0xaa   :  { %527 = vmatpush.bf16.msrb.mxu0 %v740_v10 }
  0xab   :  { %v332_v18 = vadd.f32 %v313_v9, %v258_v13 }
  0xad   :  { %v339_v21 = vmax.f32 %v332_v18, 0.0 }
  0xae   :  { %v174_v14 = vpop.f32.mrf.mxu1 }
  0xaf   :  { %v192_v15 = vadd.f32 %v174_v14, %v118_v12  ;;  %v549_v12 = vld [vmem:[%s1073_s12] sm:$0xff]  ;;  %v550_v14 = vld [vmem:[%s1073_s12 + $0x8] sm:$0xff] }
  0xb0   :  { %v315_v17 = vpop.f32.mrf.mxu3 }
  0xb1   :  { %v259_v19 = vadd.f32 %v241_v11, %v192_v15  ;;  %v773_v11 = vmov 0   ;;  %v772_v15 = vld [vmem:[%s1070_s10] ss:$0 sm:$0xff] }
  0xb2   :  { %768 = vset.pattern.permute.xlu0 %v773_v11  ;;  %769 = vset.pattern.permute.xlu1 %v773_v11 }
  0xb3   :  { %v333_v20 = vadd.f32 %v315_v17, %v259_v19  ;;  %558 = vperm.xlu0 %768, %v549_v12   ;;  %770 = vset.pattern.permute.xlu2 %v773_v11  ;;  %v551_v19 = vld [vmem:[%s1073_s12 + $0x10] sm:$0xff] }
  0xb4   :  { %568 = vperm.xlu1 %769, %v551_v19  }
  0xb5   :  { %v340_v23 = vmax.f32 %v333_v20, 0.0 }
  0xb6   :  { %v177_v25 = vpop.f32.mrf.mxu1 }
  0xb7   :  { %v346_v26 = vpack.c.bf16 %v340_v23, %v339_v21  ;;  %v193_v28 = vadd.f32 %v177_v25, %v119_v22 }
  0xb8   :  { %v318_v27 = vpop.f32.mrf.mxu3 }
  0xb9   :  { %426 = vmatmul.bf16.vlgmr.msrb.gmra.mxu2 %v346_v26  ;;  %v260_v31 = vadd.f32 %v244_v24, %v193_v28  ;;  %v552_v24 = vld [vmem:[%s1073_s12 + $0x18] sm:$0xff] }
  0xbb   :  { %v334_v36 = vadd.f32 %v318_v27, %v260_v31  ;;  %563 = vperm.xlu0 %768, %v550_v14   ;;  %v555_v27 = vld [vmem:[%s1073_s12 + $0x30] sm:$0xff] }
  0xbc   :  { %573 = vperm.xlu1 %769, %v552_v24  }
  0xbd   :  { %v341_v40 = vmax.f32 %v334_v36, 0.0 }
  0xbe   :  { %v179_v32 = vpop.f32.mrf.mxu1 }
  0xbf   :  { %v194_v33 = vadd.f32 %v179_v32, %v120_v30  ;;  %v553_v32 = vld [vmem:[%s1073_s12 + $0x20] sm:$0xff] }
  0xc0   :  { %v320_v35 = vpop.f32.mrf.mxu3  ;;  %578 = vperm.xlu2 %770, %v553_v32  }
  0xc1   :  { %v261_v37 = vadd.f32 %v246_v34, %v194_v33  ;;  %v554_v34 = vld [vmem:[%s1073_s12 + $0x28] sm:$0xff] }
  0xc3   :  { %v335_v38 = vadd.f32 %v320_v35, %v261_v37  ;;  %588 = vperm.xlu0 %768, %v555_v27  }
  0xc5   :  { %v342_v41 = vmax.f32 %v335_v38, 0.0 }
  0xc6   :  { %v182_v42 = vpop.f32.mrf.mxu1 }
  0xc7   :  { %v195_v43 = vadd.f32 %v182_v42, %v121_v39  ;;  %v347_v44 = vpack.c.bf16 %v342_v41, %v341_v40 }
  0xc8   :  { %v323_v45 = vpop.f32.mrf.mxu3  ;;  %583 = vperm.xlu2 %770, %v554_v34  }
  0xc9   :  { %v262_v46 = vadd.f32 %v249_v56, %v195_v43  ;;  %431 = vmatmul.bf16.gmra.mxu2 %v347_v44 }
  0xcb   :  { %v336_v54 = vadd.f32 %v323_v45, %v262_v46 }
  0xcd   :  { %v343_v59 = vmax.f32 %v336_v54, 0.0 }
  0xce   :  { %v184_v50 = vpop.f32.mrf.mxu1 }
  0xcf   :  { %v196_v51 = vadd.f32 %v184_v50, %v122_v49 }
  0xd0   :  { %v325_v53 = vpop.f32.mrf.mxu3 }
  0xd1   :  { %v263_v55 = vadd.f32 %v983_v60, %v196_v51 }
  0xd3   :  { %v337_v56 = vadd.f32 %v325_v53, %v263_v55 }
  0xd5   :  { %v344_v61 = vmax.f32 %v337_v56, 0.0 }
  0xd6   :  { %v187_v62 = vpop.f32.mrf.mxu1 }
  0xd7   :  { %v197_v1 = vadd.f32 %v187_v62, %v123_v58  ;;  %v348_v2 = vpack.c.bf16 %v344_v61, %v343_v59 }
  0xd8   :  { %v328_v4 = vpop.f32.mrf.mxu3 }
  0xd9   :  { %436 = vmatmul.bf16.gmra.mxu2 %v348_v2  ;;  %v264_v60 = vadd.f32 %v993_v0, %v197_v1  ;;  %v739_v0 = vld [vmem:[%s1072_s11] sm:$0xff] }
  0xda   :  { %528 = vmatpush.bf16.msrb.mxu0 %v739_v0 }
  0xdb   :  { %v338_v7 = vadd.f32 %v328_v4, %v264_v60 }
  0xdd   :  { %v345_v9 = vmax.f32 %v338_v7, 0.0 }
  0xde   :  { %v189_v6 = vpop.f32.mrf.mxu1 }
  0xdf   :  { %v349_v63 = vpack.c.bf16 %v345_v9, %v345_v9 }
  0xe0   :  { %v330_v8 = vpop.f32.mrf.mxu3 }
  0xe9   :  { %441 = vmatmul.bf16.gmra.mxu2 %v349_v63 }
 0x11a   :  { %v579_v61 = vpop.permute.xlu2 %578 }
 0x122   :  { %v584_v1 = vpop.permute.xlu2 %583 }
 0x125   :  { %v559_v46 = vpop.permute.xlu0 %558 }
 0x126   :  { %v569_v53 = vpop.permute.xlu1 %568 }
 0x12d   :  { %v564_v48 = vpop.permute.xlu0 %563 }
 0x12e   :  { %v574_v55 = vpop.permute.xlu1 %573 }
 0x135   :  { %v589_v6 = vpop.permute.xlu0 %588 }
 0x13c   :  { %v427_v13 = vpop.f32.mrf.mxu2 }
 0x13d   :  { %v428_v16 = vadd.f32 %v772_v15, %v427_v13 }
 0x13f   :  { %v446_v20 = vmax.f32 %v428_v16, 0.0 }
 0x144   :  { %v429_v17 = vpop.f32.mrf.mxu2 }
 0x145   :  { %v430_v18 = vadd.f32 %v772_v15, %v429_v17 }
 0x147   :  { %v447_v21 = vmax.f32 %v430_v18, 0.0 }
 0x149   :  { %v453_v22 = vpack.c.bf16 %v447_v21, %v446_v20 }
 0x14b   :  { %529 = vmatmul.bf16.vlgmr.msrb.gmra.mxu0 %v453_v22 }
 0x14c   :  { %v432_v23 = vpop.f32.mrf.mxu2 }
 0x14d   :  { %v433_v25 = vadd.f32 %v772_v15, %v432_v23 }
 0x14f   :  { %v448_v29 = vmax.f32 %v433_v25, 0.0 }
 0x154   :  { %v434_v26 = vpop.f32.mrf.mxu2 }
 0x155   :  { %v435_v28 = vadd.f32 %v772_v15, %v434_v26 }
 0x157   :  { %v449_v30 = vmax.f32 %v435_v28, 0.0 }
 0x159   :  { %v454_v31 = vpack.c.bf16 %v449_v30, %v448_v29 }
 0x15b   :  { %534 = vmatmul.bf16.gmra.mxu0 %v454_v31 }
 0x15c   :  { %v437_v33 = vpop.f32.mrf.mxu2 }
 0x15d   :  { %v438_v35 = vadd.f32 %v772_v15, %v437_v33 }
 0x15f   :  { %v450_v38 = vmax.f32 %v438_v35, 0.0 }
 0x164   :  { %v439_v36 = vpop.f32.mrf.mxu2 }
 0x165   :  { %v440_v37 = vadd.f32 %v772_v15, %v439_v36 }
 0x167   :  { %v451_v39 = vmax.f32 %v440_v37, 0.0 }
 0x169   :  { %v455_v40 = vpack.c.bf16 %v451_v39, %v450_v38 }
 0x16b   :  { %539 = vmatmul.bf16.gmra.mxu0 %v455_v40 }
 0x16c   :  { %v442_v41 = vpop.f32.mrf.mxu2 }
 0x16d   :  { %v443_v42 = vadd.f32 %v772_v15, %v442_v41 }
 0x16f   :  { %v452_v44 = vmax.f32 %v443_v42, 0.0 }
 0x171   :  { %v456_v45 = vpack.c.bf16 %v452_v44, %v452_v44 }
 0x174   :  { %v444_v43 = vpop.f32.mrf.mxu2 }
 0x17b   :  { %544 = vmatmul.bf16.gmra.mxu0 %v456_v45 }
 0x1c8   :  { %v530_v47 = vpop.f32.mrf.mxu0 }
 0x1c9   :  { %v591_v50 = vmul.f32 %v559_v46, %v530_v47 }
 0x1d0   :  { %v532_v49 = vpop.f32.mrf.mxu0 }
 0x1d1   :  { %v592_v51 = vmul.f32 %v564_v48, %v532_v49 }
 0x1d3   :  { %v750_v52 = vpack.c.bf16 %v592_v51, %v591_v50 }
 0x1d5   :  { %751 = vst [vmem:[%s1074_s13] sm:$0xff] %v750_v52  }
 0x1d8   :  { %v535_v54 = vpop.f32.mrf.mxu0 }
 0x1d9   :  { %v593_v57 = vmul.f32 %v569_v53, %v535_v54 }
 0x1e0   :  { %v537_v56 = vpop.f32.mrf.mxu0 }
 0x1e1   :  { %v594_v58 = vmul.f32 %v574_v55, %v537_v56 }
 0x1e3   :  { %v755_v59 = vpack.c.bf16 %v594_v58, %v593_v57 }
 0x1e5   :  { %762 = vst [vmem:[%s1074_s13 + $0x8] sm:$0xff] %v755_v59  }
 0x1e8   :  { %v540_v62 = vpop.f32.mrf.mxu0 }
 0x1e9   :  { %v595_v3 = vmul.f32 %v579_v61, %v540_v62 }
 0x1f0   :  { %v542_v2 = vpop.f32.mrf.mxu0 }
 0x1f1   :  { %v596_v4 = vmul.f32 %v584_v1, %v542_v2 }
 0x1f3   :  { %v760_v60 = vpack.c.bf16 %v596_v4, %v595_v3 }
 0x1f5   :  { %763 = vst [vmem:[%s1074_s13 + $0x10] sm:$0xff] %v760_v60  }
 0x1f8   :  { %v545_v7 = vpop.f32.mrf.mxu0 }
 0x1f9   :  { %v597_v8 = vmul.f32 %v589_v6, %v545_v7 }
 0x1fb   :  { %v604_v9 = vpack.c.bf16 %v597_v8, %v597_v8 }
 0x1fd   :  { %611 = vst [vmem:[%s1074_s13 + $0x18] sm:$0xf] %v604_v9 }
 0x200   :  { %v547_v63 = vpop.f32.mrf.mxu0 }

</bundles_post_ra>
